<compile_context>
chip_gen: v5e
topology: v5e:2x2
jax: 0.10.0
libtpu: 0.0.40
codegen_flags: <defaults>
</compile_context>

<pallas_src>
import functools

import jax
import jax.numpy as jnp
from jax.experimental import pallas as pl
from jax.experimental.pallas import tpu as pltpu


# ----------------------------------------------------------------------------
# Pallas kernel: out = x * cos + rotate_half(x) * sin  (interleaved channels)
# The roll wrap-around only ever lands on lanes whose table entry is zero
# (opposite parity / pad lanes), so it never leaks into the result.
# ----------------------------------------------------------------------------
def _rope_kernel(x_ref, cos_ref, sine_ref, sino_ref, o_ref, *,
                 tm, tbl_bpb, rep, lane_len):
    if tbl_bpb > 1:
        # Tables are VMEM-resident as one full (L, w) block; slice our rows.
        r0 = pl.multiple_of((pl.program_id(0) % tbl_bpb) * tm, 8)
        cos = cos_ref[pl.ds(r0, tm), :]
        s_e = sine_ref[pl.ds(r0, tm), :]
        s_o = sino_ref[pl.ds(r0, tm), :]
    else:
        cos = cos_ref[...]
        s_e = sine_ref[...]
        s_o = sino_ref[...]
    if rep > 1:
        cos = jnp.tile(cos, (1, rep))
        s_e = jnp.tile(s_e, (1, rep))
        s_o = jnp.tile(s_o, (1, rep))

    x = x_ref[...]
    nxt = pltpu.roll(x, shift=lane_len - 1, axis=1)   # nxt[k] = x[(k+1) % lane_len]
    prv = pltpu.roll(x, shift=1, axis=1)              # prv[k] = x[(k-1) % lane_len]
    o_ref[...] = (x * cos + nxt * s_e + prv * s_o).astype(o_ref.dtype)


# ----------------------------------------------------------------------------
# Angle table construction (glue, deterministic, mirrors the PyTorch forward)
# ----------------------------------------------------------------------------
def _build_channel_angles(dim, ft_seq_len, pt_seq_len, theta, hw_shapes, window_size):
    half = dim // 2
    inv = jnp.power(
        jnp.float32(theta),
        -(jnp.arange(0, dim, 2)[:half].astype(jnp.float32)) / jnp.float32(dim),
    )                                                     # (half,)
    per_shape = []
    for (H, W) in hw_shapes:
        th = jnp.arange(H, dtype=jnp.float32) / ft_seq_len * pt_seq_len
        tw = jnp.arange(W, dtype=jnp.float32) / ft_seq_len * pt_seq_len
        fh = jnp.repeat(th[:, None] * inv[None, :], 2, axis=-1)   # (H, dim) interleaved
        fw = jnp.repeat(tw[:, None] * inv[None, :], 2, axis=-1)   # (W, dim)
        fh = jnp.broadcast_to(fh[:, None, :], (H, W, dim))
        fw = jnp.broadcast_to(fw[None, :, :], (H, W, dim))
        ang = jnp.concatenate([fh, fw], axis=-1)                  # (H, W, 2*dim)
        if window_size is not None:
            ws1, ws2 = window_size
            h, w = H // ws1, W // ws2
            ang = (ang.reshape(h, ws1, w, ws2, 2 * dim)
                      .transpose(0, 2, 1, 3, 4)
                      .reshape(h * w * ws1 * ws2, 2 * dim))
        else:
            ang = ang.reshape(H * W, 2 * dim)
        per_shape.append(ang)
    return jnp.concatenate(per_shape, axis=0)             # (L, C) per-channel angles


# ----------------------------------------------------------------------------
# Hardware-aware VMEM budgets and tile-size selection
# ----------------------------------------------------------------------------
def _vmem_budgets():
    cap = None
    try:
        info = pltpu.get_tpu_info()
        cap = getattr(info, "vmem_capacity_bytes", None)
    except Exception:
        cap = None
    if not cap:
        cap = 64 * 1024 * 1024          # conservative (v7x-sized) assumption
    limit = min((3 * cap) // 4, 100 * 1024 * 1024)   # 48 MiB on v7x, 96 MiB on v5e/v6e
    return int(limit), int(limit) // 2


def _pick_tm(rows, total_rows, per_row_bytes, budget_bytes):
    """Largest divisor of `rows` (multiple of 8) fitting the per-step budget,
    preferring >= 4 grid steps (both v7x cores pipelined), then >= 2."""
    cands = [d for d in range(8, rows + 1, 8) if rows % d == 0]
    if not cands:
        return None
    fitting = [d for d in cands if d * per_row_bytes <= budget_bytes]
    if not fitting:
        fitting = [min(cands)]
    for min_steps in (4, 2, 1):
        pool = [d for d in fitting if total_rows // d >= min_steps]
        if pool:
            return max(pool)
    return max(fitting)


def _pick_table_width(C, N):
    """Smallest lane-dense (multiple of 128) width k*C with k | N, else N*C."""
    for k in range(1, N + 1):
        if N % k == 0 and (C * k) % 128 == 0:
            return C * k
    return C * N


# ----------------------------------------------------------------------------
# Wrapper (the "module forward")
# ----------------------------------------------------------------------------
def vision_rotary_embedding(x, batch_size, hw_shapes, window_size, shift=None, *,
                            dim, ft_seq_len, pt_seq_len, theta=10000.0):
    del shift  # only used for the host-side cache key in the PyTorch module
    M, N, C = x.shape
    assert C == 2 * dim, "channel dim must be 2*dim"

    ang = _build_channel_angles(dim, ft_seq_len, pt_seq_len, theta,
                                hw_shapes, window_size)        # (L, C), f32
    L = int(ang.shape[0])
    assert M == batch_size * L, f"expected M == batch_size*L ({batch_size}*{L}), got {M}"

    vmem_limit, step_budget = _vmem_budgets()

    NC = N * C
    NCp = ((NC + 127) // 128) * 128      # lane-dense padded width
    pad = NCp - NC
    x_item = x.dtype.itemsize

    # f32 tables with the rotate_half parity/sign folded in.
    cos_c = jnp.cos(ang)                                   # (L, C)
    sin_c = jnp.sin(ang)
    even = (jnp.arange(C) % 2) == 0
    sine_c = jnp.where(even, sin_c, 0.0)                   # sin on even lanes, 0 on odd
    sino_c = jnp.where(even, 0.0, -sin_c)                  # -sin on odd lanes, 0 on even

    # Lane-dense table width: full NCp when cheap (removes in-kernel tile),
    # else the smallest 128-multiple that divides NCp.
    if pad > 0 or 3 * L * NCp * 4 <= 8 * 1024 * 1024:
        w_tbl = NCp
    else:
        w_tbl = _pick_table_width(C, N)

    def _widen(t):                                         # (L, C) -> (L, w_tbl)
        if w_tbl == NCp and pad > 0:
            t = jnp.tile(t, (1, N))
            return jnp.pad(t, ((0, 0), (0, pad)))
        return jnp.tile(t, (1, w_tbl // C))

    cos_t, sine_t, sino_t = _widen(cos_c), _widen(sine_c), _widen(sino_c)
    rep = NCp // w_tbl

    x2 = x.reshape(M, NC)                                  # contiguous reshape (free)
    if pad > 0:
        # TODO(synk): lane-masked stores could avoid this extra HBM copy.
        x2 = jnp.pad(x2, ((0, 0), (0, pad)))

    tbl_bytes = 3 * L * w_tbl * 4
    tables_resident = False
    tm = None
    if L % 8 == 0:
        tables_resident = (2 * tbl_bytes) <= (step_budget // 2)
        x_budget = step_budget - (2 * tbl_bytes if tables_resident else 0)
        per_row = 4 * NCp * x_item + (0 if tables_resident else 6 * w_tbl * 4)
        tm = _pick_tm(L, M, per_row, max(x_budget, 1))

    if tm is not None:
        # Main path: tile over tokens; tables indexed per image position.
        grid = (M // tm,)
        bpb = L // tm
        x_spec = pl.BlockSpec((tm, NCp), lambda i: (i, 0))
        out_spec = pl.BlockSpec((tm, NCp), lambda i: (i, 0))
        if tables_resident:
            t_spec = pl.BlockSpec((L, w_tbl), lambda i: (0, 0))   # loaded once
            k_tbl_bpb = bpb
        else:
            t_spec = pl.BlockSpec((tm, w_tbl), lambda i: (i % bpb, 0))
            k_tbl_bpb = 1
    else:
        # Fallback (L not a multiple of 8): replicate tables over the batch so
        # any tm | M works; worst case a single full-array block.
        cos_t = jnp.tile(cos_t, (batch_size, 1))
        sine_t = jnp.tile(sine_t, (batch_size, 1))
        sino_t = jnp.tile(sino_t, (batch_size, 1))
        per_row = 4 * NCp * x_item + 6 * w_tbl * 4
        tm = _pick_tm(M, M, per_row, step_budget)
        if tm is None:
            tm = M
        grid = (M // tm,)
        x_spec = pl.BlockSpec((tm, NCp), lambda i: (i, 0))
        out_spec = pl.BlockSpec((tm, NCp), lambda i: (i, 0))
        t_spec = pl.BlockSpec((tm, w_tbl), lambda i: (i, 0))
        k_tbl_bpb = 1

    cost = pl.CostEstimate(
        flops=5 * M * NCp,
        transcendentals=0,
        bytes_accessed=2 * M * NCp * x_item + 3 * int(cos_t.shape[0]) * w_tbl * 4,
    )

    kernel = functools.partial(_rope_kernel, tm=tm, tbl_bpb=k_tbl_bpb,
                               rep=rep, lane_len=NCp)
    out2 = pl.pallas_call(
        kernel,
        out_shape=jax.ShapeDtypeStruct((M, NCp), x.dtype),
        grid_spec=pltpu.PrefetchScalarGridSpec(
            num_scalar_prefetch=0,
            grid=grid,
            in_specs=[x_spec, t_spec, t_spec, t_spec],
            out_specs=out_spec,
        ),
        compiler_params=pltpu.CompilerParams(
            dimension_semantics=("parallel",),
            vmem_limit_bytes=vmem_limit,
        ),
        cost_estimate=cost,
    )(x2, cos_t, sine_t, sino_t)

    if pad > 0:
        out2 = out2[:, :NC]
    return out2.reshape(M, N, C)


# ----------------------------------------------------------------------------
# Pure-JAX reference (literal transcription of the PyTorch forward)
# ----------------------------------------------------------------------------
def _rotate_half_ref(x):
    xp = x.reshape(*x.shape[:-1], -1, 2)
    x0, x1 = xp[..., 0], xp[..., 1]
    return jnp.stack([x1, -x0], axis=-1).reshape(x.shape)


def _reference_forward(x, batch_size, hw_shapes, window_size, *,
                       dim, ft_seq_len, pt_seq_len, theta=10000.0):
    half = dim // 2
    inv = jnp.power(jnp.float32(theta),
                    -(jnp.arange(0, dim, 2)[:half].astype(jnp.float32)) / jnp.float32(dim))
    flist = []
    for (H, W) in hw_shapes:
        fh = (jnp.arange(H, dtype=jnp.float32) / ft_seq_len * pt_seq_len)[:, None] * inv[None, :]
        fh = jnp.repeat(fh, 2, axis=-1)                        # (H, dim)
        fw = (jnp.arange(W, dtype=jnp.float32) / ft_seq_len * pt_seq_len)[:, None] * inv[None, :]
        fw = jnp.repeat(fw, 2, axis=-1)                        # (W, dim)
        fh = jnp.broadcast_to(fh[:, None, :], (H, W, dim))
        fw = jnp.broadcast_to(fw[None, :, :], (H, W, dim))
        f = jnp.concatenate([fh, fw], axis=-1)                 # (H, W, 2*dim)
        if window_size is not None:
            ws1, ws2 = window_size
            h, w = H // ws1, W // ws2
            f = (f.reshape(h, ws1, w, ws2, 2 * dim)
                   .transpose(0, 2, 1, 3, 4)
                   .reshape(-1, 2 * dim))
        else:
            f = f.reshape(-1, 2 * dim)
        flist.append(f)
    f = jnp.concatenate(flist, axis=0)
    f = jnp.tile(f, (batch_size, 1))[:, None, :]               # (B*L, 1, 2*dim)
    return x * jnp.cos(f) + _rotate_half_ref(x) * jnp.sin(f)


if __name__ == "__main__":
    # Module config (deterministic "parameters": the freqs buffer derives from these).
    dim = 16            # rotary dim per spatial axis -> C = 2*dim = 32
    ft_seq_len = 8
    pt_seq_len = 16
    theta = 10000.0

    # Forward config.
    batch_size = 2
    hw_shapes = [(8, 8)]
    window_size = (4, 4)
    shift = 0
    N = 4               # inner (heads) dim -> N*C = 128 (lane-dense)
    C = 2 * dim
    L = sum(H * W for H, W in hw_shapes)
    M = batch_size * L  # 128

    key = jax.random.PRNGKey(0)
    x = jax.random.normal(key, (M, N, C), dtype=jnp.float32)

    out = vision_rotary_embedding(
        x, batch_size, hw_shapes, window_size, shift,
        dim=dim, ft_seq_len=ft_seq_len, pt_seq_len=pt_seq_len, theta=theta)
    out = jax.block_until_ready(out)

    ref = _reference_forward(
        x, batch_size, hw_shapes, window_size,
        dim=dim, ft_seq_len=ft_seq_len, pt_seq_len=pt_seq_len, theta=theta)
    ref = jax.block_until_ready(ref)

    assert out.shape == (M, N, C) and out.dtype == x.dtype
    assert jnp.allclose(out, ref, rtol=1e-5, atol=1e-5)
    print("KERNEL_OK")
</pallas_src>

<mosaic_0001>
module attributes {stable_mosaic.version = 11 : i64} {
  func.func @_rope_kernel(%arg0: i32, %arg1: memref<32x128xf32, #tpu.memory_space<vmem>>, %arg2: memref<64x128xf32, #tpu.memory_space<vmem>>, %arg3: memref<64x128xf32, #tpu.memory_space<vmem>>, %arg4: memref<64x128xf32, #tpu.memory_space<vmem>>, %arg5: memref<32x128xf32, #tpu.memory_space<vmem>>) attributes {dimension_semantics = [#tpu.dimension_semantics<parallel>], iteration_bounds = array<i64: 4>, scalar_prefetch = 0 : i64, scratch_operands = 0 : i64, tpu.core_type = #tpu.core_type<tc>, window_params = [{transform_indices = @transform_0, window_bounds = array<i64: 32, 128>}, {pipeline_mode = #tpu.pipeline_mode<synchronous>, transform_indices = @transform_1, window_bounds = array<i64: 64, 128>}, {pipeline_mode = #tpu.pipeline_mode<synchronous>, transform_indices = @transform_2, window_bounds = array<i64: 64, 128>}, {pipeline_mode = #tpu.pipeline_mode<synchronous>, transform_indices = @transform_3, window_bounds = array<i64: 64, 128>}, {transform_indices = @transform_4, window_bounds = array<i64: 32, 128>}]} {
    %c2_i32 = arith.constant 2 : i32
    %c0_i32 = arith.constant 0 : i32
    %0 = arith.cmpi eq, %c2_i32, %c0_i32 : i32
    %c1_i32 = arith.constant 1 : i32
    %1 = arith.select %0, %c1_i32, %c2_i32 : i32
    %2 = arith.remsi %arg0, %1 : i32
    %c0_i32_0 = arith.constant 0 : i32
    %3 = arith.cmpi ne, %2, %c0_i32_0 : i32
    %c0_i32_1 = arith.constant 0 : i32
    %4 = arith.cmpi slt, %2, %c0_i32_1 : i32
    %c0_i32_2 = arith.constant 0 : i32
    %5 = arith.cmpi slt, %1, %c0_i32_2 : i32
    %6 = arith.xori %4, %5 : i1
    %7 = arith.andi %6, %3 : i1
    %8 = arith.addi %2, %1 : i32
    %9 = arith.select %7, %8, %2 : i32
    %c32_i32 = arith.constant 32 : i32
    %10 = arith.muli %9, %c32_i32 : i32
    %11 = tpu.assume_multiple %10, 8 : i32
    %12 = arith.index_cast %11 : i32 to index
    %c0 = arith.constant 0 : index
    %13 = vector.load %arg2[%12, %c0] : memref<64x128xf32, #tpu.memory_space<vmem>>, vector<32x128xf32>
    %14 = arith.index_cast %11 : i32 to index
    %c0_3 = arith.constant 0 : index
    %15 = vector.load %arg3[%14, %c0_3] : memref<64x128xf32, #tpu.memory_space<vmem>>, vector<32x128xf32>
    %16 = arith.index_cast %11 : i32 to index
    %c0_4 = arith.constant 0 : index
    %17 = vector.load %arg4[%16, %c0_4] : memref<64x128xf32, #tpu.memory_space<vmem>>, vector<32x128xf32>
    %c0_5 = arith.constant 0 : index
    %c0_6 = arith.constant 0 : index
    %18 = vector.load %arg1[%c0_5, %c0_6] : memref<32x128xf32, #tpu.memory_space<vmem>>, vector<32x128xf32>
    %c127_i32 = arith.constant 127 : i32
    %19 = tpu.dynamic_rotate %18 by %c127_i32 dim 1 : vector<32x128xf32>, i32 -> vector<32x128xf32>
    %c1_i32_7 = arith.constant 1 : i32
    %20 = tpu.dynamic_rotate %18 by %c1_i32_7 dim 1 : vector<32x128xf32>, i32 -> vector<32x128xf32>
    %21 = arith.mulf %18, %13 : vector<32x128xf32>
    %22 = arith.mulf %19, %15 : vector<32x128xf32>
    %23 = arith.addf %21, %22 : vector<32x128xf32>
    %24 = arith.mulf %20, %17 : vector<32x128xf32>
    %25 = arith.addf %23, %24 : vector<32x128xf32>
    %c0_8 = arith.constant 0 : index
    %c0_9 = arith.constant 0 : index
    %26 = vector.load %arg5[%c0_8, %c0_9] : memref<32x128xf32, #tpu.memory_space<vmem>>, vector<32x128xf32>
    tpu.vector_store %arg5[%c0_8, %c0_9], %25 {strides = array<i32>} : memref<32x128xf32, #tpu.memory_space<vmem>>, vector<32x128xf32>,
    return
  }
  func.func @transform_0(%arg0: i32) -> (i32, i32) {
    %c0_i32 = arith.constant 0 : i32
    %c0_i32_0 = arith.constant 0 : i32
    return %arg0, %c0_i32 : i32, i32
  }
  func.func @transform_1(%arg0: i32) -> (i32, i32) {
    %c0_i32 = arith.constant 0 : i32
    %c0_i32_0 = arith.constant 0 : i32
    %c0_i32_1 = arith.constant 0 : i32
    return %c0_i32, %c0_i32_0 : i32, i32
  }
  func.func @transform_2(%arg0: i32) -> (i32, i32) {
    %c0_i32 = arith.constant 0 : i32
    %c0_i32_0 = arith.constant 0 : i32
    %c0_i32_1 = arith.constant 0 : i32
    return %c0_i32, %c0_i32_0 : i32, i32
  }
  func.func @transform_3(%arg0: i32) -> (i32, i32) {
    %c0_i32 = arith.constant 0 : i32
    %c0_i32_0 = arith.constant 0 : i32
    %c0_i32_1 = arith.constant 0 : i32
    return %c0_i32, %c0_i32_0 : i32, i32
  }
  func.func @transform_4(%arg0: i32) -> (i32, i32) {
    %c0_i32 = arith.constant 0 : i32
    %c0_i32_0 = arith.constant 0 : i32
    return %arg0, %c0_i32 : i32, i32
  }
}

</mosaic_0001>

<bundles_post_ra>
// kernel: tpu_custom_call.1
= control target key start
LH: loop header
LB: loop body
LE: loop exit
PB: predicated region body
PF: predicated region fallthrough
CT: control target
= control target key end

     0   :  { %9 = vsyncpa [#allocation3], 0  ;;  %s993_s0 = inlined_call_operand.hbm [shape: f32[128,128], index: 0, kind: input, shape index: {}]   ;;  %s994_s1 = inlined_call_operand.hbm [shape: f32[64,128], index: 1, kind: input, shape index: {}]   ;;  %s995_s2 = inlined_call_operand.hbm [shape: f32[64,128], index: 2, kind: input, shape index: {}]   ;;  %s996_s3 = inlined_call_operand.hbm [shape: f32[64,128], index: 3, kind: input, shape index: {}]   ;;  %s997_s4 = inlined_call_operand.hbm [shape: f32[128,128], index: 4, kind: output, shape index: {}]  }
   0x1   :  { %11 = vsyncpa [#allocation3 + $0x1], 0 }
   0x2   :  { %12 = vsyncpa [#allocation6], 0 }
   0x3   :  { %13 = vsyncpa [#allocation9], 0 }
   0x4   :  { %14 = vsyncpa [#allocation4], 0 }
   0x5   :  { %16 = vsyncpa [#allocation4 + $0x1], 0  ;;  %s805_s15 = smov 0   ;;  %s807_s16 = smov 0  }
   0x6   :  { %s809_s17 = smov 0   ;;  %s811_s18 = smov 0  }
   0x7 LB: > { %s826_s19 = sadd.s32 4294967295, %s769_s18   ;;  %s466_s20 = sadd.s32 4294967294, %s769_s18   ;;  %s769_s18 = sphi %s811_s18, %s1007_s18   ;;  %s765_s17 = sphi %s809_s17, %s1006_s17   ;;  %s761_s16 = sphi %s807_s16, %s1005_s16   ;;  %s757_s15 = sphi %s805_s15, %s1004_s15  }
   0x8   : > { %p42_p0 = scmp.ne.s32.totalorder %s761_s16, %s757_s15  ;;  %p43_p1 = scmp.eq.s32.totalorder %s826_s19, 0 }
   0x9   : > { %p129_p2 = scmp.eq.s32.totalorder %s826_s19, 3  ;;  %p135_p3 = scmp.eq.s32.totalorder %s466_s20, 3 }
   0xa   : > { %p835_p4 = por %p43_p1, %p42_p0  ;;  %p467_p5 = scmp.ge.s32.totalorder %s769_s18, 1 }
   0xb   : > { %p840_p6 = por %p135_p3, %p42_p0  ;;  %p142_p7 = scmp.lt.s32.totalorder %s769_s18, 5 }
   0xc   : > { %s153_s25 = sshll.u32 %s994_s1, 4  ;;  %s771_s27 = smov [#allocation5]   ;;  %s154_s25 = int_to_ptr.hbm [resolvable:$true] %s153_s25 }
   0xd   : > { %p848_p8 = pnand %p467_p5, %p142_p7  ;;  %s155_s28 = sshll.u32 %s771_s27, 4  ;;  %s156_s28 = int_to_ptr.vmem [resolvable:$true] %s155_s28 }
   0xe   : > { %s167_s6 = sshll.u32 %s995_s2, 4  ;;  %s772_s7 = smov 128   ;;  %s168_s6 = int_to_ptr.hbm [resolvable:$true] %s167_s6 }
   0xf   : > { %p508_p9 = pneg %p848_p8  ;;  %s773_s8 = smov 8  }
  0x10   : > { %s774_s9 = smov [#allocation7]   ;;  %s181_s13 = sshll.u32 %s996_s3, 4  ;;  %s182_s13 = int_to_ptr.hbm [resolvable:$true] %s181_s13 }
  0x11   : > { %p856_p10 = pnand %p508_p9, %p43_p1  ;;  %s169_s10 = sshll.u32 %s774_s9, 4  ;;  %s170_s10 = int_to_ptr.vmem [resolvable:$true] %s169_s10 }
  0x12   : > { %s775_s14 = smov [#allocation8]   ;;  %s877_s23 = sadd.s32 1, %s769_s18  }
  0x13   : > { %511 = dma.hbm_to_vmem [thread:$0]  (!%p856_p10), %s154_s25, 1024, %s156_s28, [#allocation6], %s772_s7, %s772_s7, %s773_s8  }
  0x14   : > { %514 = dma.hbm_to_vmem [thread:$0]  (!%p856_p10), %s168_s6, 1024, %s170_s10, [#allocation6], %s772_s7, %s772_s7, %s773_s8  }
  0x15   : > { %s183_s20 = sshll.u32 %s775_s14, 4  ;;  %s26_s24 = ssub.s32 %s769_s18, %s877_s23  ;;  %s184_s20 = int_to_ptr.vmem [resolvable:$true] %s183_s20 }
  0x16   : > { %517 = dma.hbm_to_vmem [thread:$0]  (!%p856_p10), %s182_s13, 1024, %s184_s20, [#allocation9], %s772_s7, %s772_s7, %s773_s8  }
  0x17   : > { %s29_s25 = sadd.s32 1, %s765_s17  ;;  %p27_p11 = scmp.eq.s32.totalorder %s26_s24, 0 }
  0x18   : > { %p36_p12 = scmp.ne.s32.totalorder %s765_s17, %s761_s16  ;;  %p37_p13 = scmp.eq.s32.totalorder %s769_s18, 0 }
  0x19   : > { %s891_s27 = scalar_select %p27_p11, %s765_s17, %s29_s25  }
  0x1a   : > { %p895_p0 = por %p129_p2, %p36_p12  ;;  %p529_p3 = scmp.lt.s32.totalorder %s769_s18, 4 }
  0x1b   : > { %s197_s30 = sand.u32 1, %s765_s17   ;;  %s490_s29 = sshll.u32 %s769_s18, 5 }
  0x1c   : > { %p38_p5 = por %p37_p13, %p36_p12  ;;  %s472_s5 = sshll.u32 %s197_s30, 5 }
  0x1d   : > { %s206_s10 = scalar_lea.hbm %s993_s0, %s490_s29  ;;  %s201_s12 = scalar_lea.vmem [#allocation2], %s472_s5 }
  0x1e   : > { %s207_s11 = sshll.u32 %s206_s10, 4  ;;  %s209_s13 = sshll.u32 %s201_s12, 4  ;;  %s208_s11 = int_to_ptr.hbm [resolvable:$true] %s207_s11  ;;  %s210_s13 = int_to_ptr.vmem [resolvable:$true] %s209_s13 }
  0x1f   : > { %p905_p7 = pnand %p529_p3, %p38_p5  ;;  %s198_s20 = scalar_lea.sflag [#allocation3], %s197_s30 }
  0x20   : > { %s665_s24 = sshra.s32 %s208_s11, 4  ;;  %s672_s5 = scalar_lea.hbm %s993_s0, 128  ;;  %s666_s24 = int_to_ptr.hbm [resolvable:$true] %s665_s24 }
  0x21   : > { %s667_s25 = scalar_lea.hbm %s666_s24, 32  ;;  %p669_p9 = pneg %p905_p7 }
  0x22   : > { %p668_p2 = scmp.ne.s32.totalorder %s666_s24, %s667_s25  ;;  %p673_p12 = scmp.lt.s32.totalorder %s666_s24, %s993_s0 }
  0x23   : > { %p674_p13 = scmp.lt.s32.totalorder %s672_s5, %s667_s25 }
  0x24   : > { %p670_p10 = pnand %p669_p9, %p668_p2 }
  0x25   : > { %p675_p3 = por %p674_p13, %p673_p12 }
  0x26   : > { %p671_p11 = pneg %p670_p10 }
  0x28   : > { %p676_p5 = pnand %p675_p3, %p671_p11 }
  0x2a   : > { %679 = shalt.err (!%p676_p5)
}
  0x2b   : > { %521 = dma.hbm_to_vmem [thread:$0]  (!%p905_p7), %s208_s11, 512, %s210_s13, %s198_s20, %s772_s7, %s772_s7, %s773_s8  }
  0x2c   : > { %221 = sbr.rel (%p848_p8) target bundleno = 195 (0xc3), region = 36  ;;  %s925_s30 = sand.u32 (!%p848_p8), 1, %s761_s16  }
  0x2d   : > { %s476_s12 = sshll.u32 (!%p848_p8), %s925_s30, 5  ;;  %s224_s24 = scalar_lea.sflag (!%p848_p8), [#allocation3], %s925_s30 }
  0x2e   : > { %s227_s25 = scalar_lea.vmem (!%p848_p8), [#allocation2], %s476_s12 }
  0x31   : > { %740 = dma.done.wait (%p835_p4), %s224_s24, 512  }
  0x32   : > { %742 = vsyncadd (%p835_p4), %s224_s24, 4294966784 }
  0x33   : > { %744 = dma.done.wait (%p43_p1), [#allocation6], 2048  }
  0x34   : > { %746 = vsyncadd (%p43_p1), [#allocation6], 4294965248 }
  0x35   : > { %748 = dma.done.wait (%p43_p1), [#allocation9], 1024  }
  0x36   : > { %750 = vsyncadd (%p43_p1), [#allocation9], 4294966272  ;;  %v300_v0 = vld [vmem:[%s227_s25 + $0x10] sm:$0xff]  ;;  %v298_v1 = vld [vmem:[%s227_s25] sm:$0xff]  ;;  %s776_s26 = smov 127   ;;  %s777_s21 = smov 1  }
  0x37   : > { %306 = vrot.lane.b32.xlu1 %v300_v0, %s776_s26  ;;  %302 = vrot.lane.b32.xlu0 %v298_v1, %s776_s26  ;;  %v301_v2 = vld [vmem:[%s227_s25 + $0x18] sm:$0xff]  ;;  %v299_v3 = vld [vmem:[%s227_s25 + $0x8] sm:$0xff]  ;;  %s271_s7 = ssub.s32 0, %s826_s19  ;;  %p270_p1 = scmp.lt.s32.totalorder %s826_s19, 0 }
  0x38   : > { %310 = vrot.lane.b32.xlu2 %v298_v1, %s777_s21  ;;  %s481_s8 = smin.u32 %s826_s19, %s271_s7  ;;  %s952_s9 = scalar_lea.vmem [#allocation10], %s476_s12 }
  0x39   : > { %s273_s11 = sand.u32 1, %s481_s8   ;;  %s491_s10 = sshll.u32 %s826_s19, 5 }
  0x3a   : > { %s274_s13 = ssub.s32 0, %s273_s11  ;;  %s354_s25 = scalar_lea.hbm %s997_s4, %s491_s10 }
  0x3b   : > { %s1009_s13 = smov (!%p270_p1, %s274_s13), %s273_s11  ;;  %s357_s19 = sshll.u32 %s354_s25, 4  ;;  %s358_s19 = int_to_ptr.hbm [resolvable:$true] %s357_s19 }
  0x3c   : > { %p483_p4 = scmp.lt.s32.totalorder %s1009_s13, 0  ;;  %s280_s14 = sadd.s32 2, %s1009_s13 }
  0x3d   : > { %s709_s7 = sshra.s32 %s358_s19, 4  ;;  %s710_s7 = int_to_ptr.hbm [resolvable:$true] %s709_s7 }
  0x3e   : > { %s1011_s14 = smov (!%p483_p4, %s280_s14), %s1009_s13  ;;  %s711_s8 = scalar_lea.hbm %s710_s7, 32 }
  0x3f   : > { %308 = vrot.lane.b32.xlu1 %v301_v2, %s776_s26  ;;  %304 = vrot.lane.b32.xlu0 %v299_v3, %s776_s26  ;;  %s484_s20 = sshll.u32 %s1011_s14, 5  ;;  %s355_s26 = sshll.u32 %s952_s9, 4  ;;  %s356_s26 = int_to_ptr.vmem [resolvable:$true] %s355_s26 }
  0x40   : > { %312 = vrot.lane.b32.xlu2 %v299_v3, %s777_s21  ;;  %s283_s29 = scalar_lea.vmem [#allocation5], %s484_s20  ;;  %s288_s6 = scalar_lea.vmem [#allocation7], %s484_s20 }
  0x41   : > { %v284_v4 = vld [vmem:[%s283_s29] sm:$0xff]  ;;  %s946_s5 = scalar_lea.vmem [#allocation8], %s484_s20  ;;  %v285_v14 = vld [vmem:[%s283_s29 + $0x8] sm:$0xff]  ;;  %v286_v22 = vld [vmem:[%s283_s29 + $0x10] sm:$0xff]  ;;  %p712_p8 = scmp.ne.s32.totalorder %s710_s7, %s711_s8 }
  0x42   : > { %v289_v6 = vld [vmem:[%s288_s6] sm:$0xff]  ;;  %v318_v8 = vmul.f32 %v298_v1, %v284_v4  ;;  %v290_v16 = vld [vmem:[%s288_s6 + $0x8] sm:$0xff]  ;;  %v319_v19 = vmul.f32 %v299_v3, %v285_v14  ;;  %v287_v25 = vld [vmem:[%s283_s29 + $0x18] sm:$0xff]  ;;  %v320_v29 = vmul.f32 %v300_v0, %v286_v22  ;;  %s715_s14 = scalar_lea.hbm %s997_s4, 128  ;;  %p716_p9 = scmp.lt.s32.totalorder %s710_s7, %s997_s4 }
  0x43   : > { %v294_v7 = vld [vmem:[%s946_s5] sm:$0xff]  ;;  %v295_v18 = vld [vmem:[%s946_s5 + $0x8] sm:$0xff]  ;;  %v291_v26 = vld [vmem:[%s288_s6 + $0x10] sm:$0xff]  ;;  %v321_v30 = vmul.f32 %v301_v2, %v287_v25  ;;  %p713_p7 = pnand %p712_p8, %p895_p0  ;;  %p717_p10 = scmp.lt.s32.totalorder %s715_s14, %s711_s8 }
  0x44   : > { %v292_v27 = vld [vmem:[%s288_s6 + $0x18] sm:$0xff]  ;;  %v296_v35 = vld [vmem:[%s946_s5 + $0x10] sm:$0xff] }
  0x45   : > { %v297_v34 = vld [vmem:[%s946_s5 + $0x18] sm:$0xff]  ;;  %p714_p2 = pneg %p713_p7  ;;  %p718_p11 = por %p717_p10, %p716_p9 }
  0x47   : > { %316 = vrot.lane.b32.xlu1 %v301_v2, %s777_s21  ;;  %314 = vrot.lane.b32.xlu0 %v300_v0, %s777_s21  ;;  %s343_s21 = scalar_lea.sflag [#allocation4], %s925_s30  ;;  %p719_p12 = pnand %p718_p11, %p714_p2 }
  0x92   : > { %v311_v5 = vpop.permute.xlu2 %310 }
  0x93   : > { %v330_v12 = vmul.f32 %v311_v5, %v294_v7 }
  0x9a   : > { %v313_v17 = vpop.permute.xlu2 %312 }
  0x9b   : > { %v331_v24 = vmul.f32 %v313_v17, %v295_v18 }
  0xa9   : > { %v307_v9 = vpop.permute.xlu1 %306  ;;  %v303_v10 = vpop.permute.xlu0 %302 }
  0xaa   : > { %v322_v11 = vmul.f32 %v303_v10, %v289_v6  ;;  %v324_v31 = vmul.f32 %v307_v9, %v291_v26 }
  0xac   : > { %v326_v13 = vadd.f32 %v322_v11, %v318_v8  ;;  %v328_v38 = vadd.f32 %v324_v31, %v320_v29 }
  0xae   : > { %v334_v15 = vadd.f32 %v330_v12, %v326_v13 }
  0xb0   : > { %338 = vst [vmem:[%s952_s9] sm:$0xff] %v334_v15 }
  0xb1   : > { %v309_v20 = vpop.permute.xlu1 %308  ;;  %v305_v21 = vpop.permute.xlu0 %304 }
  0xb2   : > { %v323_v23 = vmul.f32 %v305_v21, %v290_v16  ;;  %v325_v32 = vmul.f32 %v309_v20, %v292_v27 }
  0xb4   : > { %v327_v28 = vadd.f32 %v323_v23, %v319_v19  ;;  %v329_v39 = vadd.f32 %v325_v32, %v321_v30 }
  0xb6   : > { %v335_v33 = vadd.f32 %v331_v24, %v327_v28 }
  0xb8   : > { %339 = vst [vmem:[%s952_s9 + $0x8] sm:$0xff] %v335_v33 }
  0xb9   : > { %v317_v36 = vpop.permute.xlu1 %316  ;;  %v315_v37 = vpop.permute.xlu0 %314 }
  0xba   : > { %v333_v40 = vmul.f32 %v317_v36, %v297_v34  ;;  %v332_v41 = vmul.f32 %v315_v37, %v296_v35 }
  0xbc   : > { %v337_v42 = vadd.f32 %v333_v40, %v329_v39  ;;  %v336_v43 = vadd.f32 %v332_v41, %v328_v38 }
  0xbe   : > { %341 = vst [vmem:[%s952_s9 + $0x18] sm:$0xff] %v337_v42 }
  0xbf   : > { %340 = vst [vmem:[%s952_s9 + $0x10] sm:$0xff] %v336_v43 }
  0xc0   : > { %722 = shalt.err (!%p719_p12)
}
  0xc1   : > { %s778_s30 = smov 128   ;;  %s779_s6 = smov 8  }
  0xc2   : > { %506 = dma.vmem_to_hbm [thread:$0]  (%p895_p0), %s356_s26, 512, %s358_s19, %s343_s21, %s778_s30, %s778_s30, %s779_s6  }
  0xc3 PF: > { %p533_p13 = scmp.ge.s32.totalorder %s769_s18, 2  ;;  %s372_s5 = sand.u32 1, %s757_s15  }
  0xc4   : > { %s373_s9 = scalar_lea.sflag [#allocation4], %s372_s5 }
  0xc5   : > { %p523_p3 = pnand %p533_p13, %p840_p6 }
  0xc7   : > { %p524_p5 = pneg %p523_p3 }
  0xc9   : > { %752 = dma.done.wait (%p524_p5), %s373_s9, 512  }
  0xca   : > { %754 = vsyncadd (%p524_p5), %s373_s9, 4294966784  ;;  %p19_p1 = scmp.ge.s32.totalorder %s877_s23, 6   ;;  %s1004_s15 = smov %s761_s16 }
  0xcb   : > { %s1005_s16 = smov %s765_s17  ;;  %s1006_s17 = smov %s891_s27 }
  0xcc   : > { %s1007_s18 = smov %s877_s23  ;;  %21 = sbr.rel (!%p19_p1) target bundleno = 7 (0x7), region = 96 }
  0xd1   :  { %379 = vsyncpa [#allocation3], 1 }
  0xd2   :  { %381 = vsyncpa [#allocation3 + $0x1], 1 }
  0xd3   :  { %382 = vsyncpa [#allocation6], 1 }
  0xd4   :  { %383 = vsyncpa [#allocation9], 1 }
  0xd5   :  { %384 = vsyncpa [#allocation4], 1 }
  0xd6   :  { %386 = vsyncpa [#allocation4 + $0x1], 1 }

</bundles_post_ra>
